<compile_context>
chip_gen: v5e
topology: v5e:2x2
jax: 0.10.0
libtpu: 0.0.40
codegen_flags: <defaults>
</compile_context>

<pallas_src>
import functools
import math

import jax
import jax.numpy as jnp
from jax import lax
from jax.experimental import pallas as pl
from jax.experimental.pallas import tpu as pltpu


def _round_up(x, m):
    return (x + m - 1) // m * m


def _vmem_capacity_bytes():
    """Best-effort query of per-core VMEM capacity; conservative fallback."""
    try:
        info = pltpu.get_tpu_info()
        cap = getattr(info, "vmem_capacity_bytes", None)
        if cap:
            return int(cap)
    except Exception:
        pass
    return 64 * 1024 * 1024  # conservative (v7x-sized) fallback


def _estimate_vmem(tq, tk, d_p, dv_p, in_bytes, out_bytes):
    """Rough per-core VMEM footprint for one grid step (double-buffered blocks,
    persistent scratch, f32 score/prob intermediates)."""
    buf = 2
    total = buf * tq * d_p * in_bytes          # Q blocks
    total += buf * tk * d_p * in_bytes         # K blocks
    total += buf * tk * dv_p * in_bytes        # V blocks
    total += buf * tq * dv_p * out_bytes       # output blocks
    total += tq * d_p * in_bytes               # scaled-Q scratch
    total += 2 * tq * 128 * 4                  # m / l scratch (lane-padded)
    total += tq * dv_p * 4                     # f32 accumulator scratch
    total += 3 * tq * tk * 4                   # s / p / elementwise temps (f32)
    return total


def _flash_attn_kernel(q_ref, k_ref, v_ref, o_ref,
                       qs_sc, m_sc, l_sc, acc_sc,
                       *, scale, kv_len, tk, mask_last):
    """One (batch, q-tile) accumulator; innermost grid axis iterates k tiles."""
    ki = pl.program_id(2)
    last_ki = pl.num_programs(2) - 1

    @pl.when(ki == 0)
    def _init():
        # Q block is invariant across ki: fold 1/sqrt(d) in once per q tile.
        qs_sc[...] = q_ref[...] * jnp.asarray(scale, dtype=q_ref.dtype)
        m_sc[...] = jnp.full_like(m_sc, -jnp.inf)
        l_sc[...] = jnp.zeros_like(l_sc)
        acc_sc[...] = jnp.zeros_like(acc_sc)

    q = qs_sc[...]                                             # (tq, d_p) native dtype
    k = k_ref[...]                                             # (tk, d_p)
    v = v_ref[...]                                             # (tk, dv_p)

    # scores = Q @ K^T — contract last dims directly (no XLU transpose of K),
    # MXU runs in the operands' native dtype with f32 accumulation.
    s = lax.dot_general(q, k, dimension_numbers=(((1,), (1,)), ((), ())),
                        preferred_element_type=jnp.float32)    # (tq, tk) f32

    if mask_last:
        # Zero-padded key positions exist only in the final k tile: gate the
        # iota/compare/select there so it never runs in the hot loop.
        def _mask(x):
            key_idx = ki * tk + lax.broadcasted_iota(jnp.int32, x.shape, 1)
            return jnp.where(key_idx < kv_len, x, jnp.float32(-1e30))

        s = lax.cond(ki == last_ki, _mask, lambda x: x, s)

    # Online (flash) softmax update.
    m_prev = m_sc[...]
    m_new = jnp.maximum(m_prev, jnp.max(s, axis=-1, keepdims=True))
    alpha = jnp.exp(m_prev - m_new)
    p = jnp.exp(s - m_new)                                     # (tq, tk) f32
    l_sc[...] = alpha * l_sc[...] + jnp.sum(p, axis=-1, keepdims=True)
    acc_sc[...] = alpha * acc_sc[...] + jnp.dot(
        p.astype(v.dtype), v, preferred_element_type=jnp.float32)
    m_sc[...] = m_new

    @pl.when(ki == last_ki)
    def _finalize():
        # Runs once per q tile, off the hot loop: exact reciprocal is free here.
        inv_l = pl.reciprocal(l_sc[...], approx=False)
        o_ref[...] = (acc_sc[...] * inv_l).astype(o_ref.dtype)


def dot_product_attention(Q_p, K_p, V_p, *, tq=512, tk=1024,
                          use_bf16_matmul=False):
    """Flash scaled dot-product attention.  Q:(B,Lq,d) K:(B,Lk,d) V:(B,Lk,dv)."""
    B, Lq, d = Q_p.shape
    Bk, Lk, dk = K_p.shape
    Bv, Lkv, dv = V_p.shape
    assert B == Bk == Bv and d == dk and Lk == Lkv

    out_dtype = Q_p.dtype
    scale = 1.0 / math.sqrt(d)          # uses the ORIGINAL d (torch semantics)

    # Opt-in bf16 MXU path: casting before the call also halves K/V HBM bytes.
    if use_bf16_matmul and Q_p.dtype == jnp.float32:
        Q_p = Q_p.astype(jnp.bfloat16)
        K_p = K_p.astype(jnp.bfloat16)
        V_p = V_p.astype(jnp.bfloat16)

    compute_dtype = Q_p.dtype
    in_bytes = jnp.dtype(compute_dtype).itemsize
    out_bytes = jnp.dtype(out_dtype).itemsize
    # dtype-aware sublane packing: 8 rows f32, 16 bf16, 32 int8/fp8.
    sub = max(8, 32 // in_bytes)

    # ---- lane-dense model dims: pad d / dv to multiples of 128 (zeros) ----
    d_p = _round_up(d, 128)
    dv_p = _round_up(dv, 128)
    if d_p != d:
        Q_p = jnp.pad(Q_p, ((0, 0), (0, 0), (0, d_p - d)))
        K_p = jnp.pad(K_p, ((0, 0), (0, 0), (0, d_p - d)))
    if dv_p != dv:
        V_p = jnp.pad(V_p, ((0, 0), (0, 0), (0, dv_p - dv)))

    # ---- generation-aware VMEM budget ----
    vmem_cap = _vmem_capacity_bytes()
    vmem_limit = min(96 * 1024 * 1024, int(0.75 * vmem_cap))
    tile_budget = int(0.8 * vmem_limit)

    # ---- tile selection ----
    tq_eff = min(tq, _round_up(Lq, sub))
    if B == 1 and Lq > sub:
        # Keep the parallel grid extent >= 2 so both v7x TensorCores get work.
        tq_eff = min(tq_eff, _round_up((Lq + 1) // 2, sub))

    Lk_full = _round_up(Lk, sub)
    if _estimate_vmem(tq_eff, Lk_full, d_p, dv_p, in_bytes, out_bytes) <= tile_budget:
        # Resident-K/V mode: whole K/V as one block (nk = 1). The K/V block
        # index then depends only on b, so Pallas DMAs them once per batch.
        tk_eff = Lk_full
    else:
        tk_eff = _round_up(min(tk, Lk_full), sub)
        while (tk_eff > sub and
               _estimate_vmem(tq_eff, tk_eff, d_p, dv_p, in_bytes, out_bytes)
               > tile_budget):
            tk_eff = _round_up(max(tk_eff // 2, sub), sub)
        while (tq_eff > sub and
               _estimate_vmem(tq_eff, tk_eff, d_p, dv_p, in_bytes, out_bytes)
               > tile_budget):
            tq_eff = _round_up(max(tq_eff // 2, sub), sub)

    Lq_p = _round_up(Lq, tq_eff)
    Lk_p = _round_up(Lk, tk_eff)
    if Lq_p != Lq:
        Q_p = jnp.pad(Q_p, ((0, 0), (0, Lq_p - Lq), (0, 0)))
    if Lk_p != Lk:
        K_p = jnp.pad(K_p, ((0, 0), (0, Lk_p - Lk), (0, 0)))
        V_p = jnp.pad(V_p, ((0, 0), (0, Lk_p - Lk), (0, 0)))

    nq = Lq_p // tq_eff
    nk = Lk_p // tk_eff
    mask_last = (Lk_p != Lk)

    kernel = functools.partial(_flash_attn_kernel,
                               scale=scale, kv_len=Lk, tk=tk_eff,
                               mask_last=mask_last)

    # Leading batch dim is squeezed (block dim None == pl.Squeezed()) so the
    # kernel works on plain 2-D tiles with no size-1 sublane layout.
    out = pl.pallas_call(
        kernel,
        out_shape=jax.ShapeDtypeStruct((B, Lq_p, dv_p), out_dtype),
        grid_spec=pltpu.PrefetchScalarGridSpec(
            num_scalar_prefetch=0,
            grid=(B, nq, nk),
            in_specs=[
                pl.BlockSpec((None, tq_eff, d_p), lambda b, qi, ki: (b, qi, 0)),
                pl.BlockSpec((None, tk_eff, d_p), lambda b, qi, ki: (b, ki, 0)),
                pl.BlockSpec((None, tk_eff, dv_p), lambda b, qi, ki: (b, ki, 0)),
            ],
            out_specs=pl.BlockSpec((None, tq_eff, dv_p),
                                   lambda b, qi, ki: (b, qi, 0)),
            scratch_shapes=[
                pltpu.VMEM((tq_eff, d_p), compute_dtype),  # scaled Q (hoisted)
                pltpu.VMEM((tq_eff, 1), jnp.float32),      # running max
                pltpu.VMEM((tq_eff, 1), jnp.float32),      # running sum
                pltpu.VMEM((tq_eff, dv_p), jnp.float32),   # output accumulator
            ],
        ),
        compiler_params=pltpu.CompilerParams(
            dimension_semantics=("parallel", "parallel", "arbitrary"),
            vmem_limit_bytes=vmem_limit,
        ),
    )(Q_p, K_p, V_p)

    # Strip sequence / lane padding.
    if Lq_p != Lq or dv_p != dv:
        out = out[:, :Lq, :dv]
    return out


def _reference(Q_p, K_p, V_p):
    d = Q_p.shape[-1]
    scores = jnp.einsum("bqd,bkd->bqk", Q_p, K_p) / jnp.sqrt(jnp.float32(d))
    attn = jax.nn.softmax(scores, axis=-1)
    return jnp.einsum("bqk,bkv->bqv", attn, V_p)


if __name__ == "__main__":
    key = jax.random.PRNGKey(0)
    kq, kk, kv = jax.random.split(key, 3)

    # Small module-consistent shapes.
    B, Lq, Lk, d, dv = 2, 8, 8, 32, 32
    Q = jax.random.normal(kq, (B, Lq, d), dtype=jnp.float32)
    K = jax.random.normal(kk, (B, Lk, d), dtype=jnp.float32)
    V = jax.random.normal(kv, (B, Lk, dv), dtype=jnp.float32)

    out = dot_product_attention(Q, K, V)
    jax.block_until_ready(out)
    ref = _reference(Q, K, V)
    assert out.shape == (B, Lq, dv)
    assert jnp.allclose(out, ref, atol=1e-4, rtol=1e-4), \
        float(jnp.max(jnp.abs(out - ref)))

    # Second case: B=1, ragged lengths / odd head dims — exercises the
    # last-tile padded-key mask, multi-q-tile + resident-K/V path.
    kq2, kk2, kv2 = jax.random.split(jax.random.PRNGKey(0), 3)
    B2, Lq2, Lk2, d2, dv2 = 1, 300, 260, 40, 24
    Q2 = jax.random.normal(kq2, (B2, Lq2, d2), dtype=jnp.float32)
    K2 = jax.random.normal(kk2, (B2, Lk2, d2), dtype=jnp.float32)
    V2 = jax.random.normal(kv2, (B2, Lk2, dv2), dtype=jnp.float32)

    out2 = dot_product_attention(Q2, K2, V2)
    jax.block_until_ready(out2)
    ref2 = _reference(Q2, K2, V2)
    assert out2.shape == (B2, Lq2, dv2)
    assert jnp.allclose(out2, ref2, atol=1e-4, rtol=1e-4), \
        float(jnp.max(jnp.abs(out2 - ref2)))

    print("KERNEL_OK")
</pallas_src>

<mosaic_0001>
module attributes {stable_mosaic.version = 11 : i64} {
  func.func @_flash_attn_kernel(%arg0: i32, %arg1: i32, %arg2: i32, %arg3: memref<1x8x128xf32, #tpu.memory_space<vmem>>, %arg4: memref<1x8x128xf32, #tpu.memory_space<vmem>>, %arg5: memref<1x8x128xf32, #tpu.memory_space<vmem>>, %arg6: memref<1x8x128xf32, #tpu.memory_space<vmem>>, %arg7: memref<8x128xf32, #tpu.memory_space<vmem>>, %arg8: memref<8x1xf32, #tpu.memory_space<vmem>>, %arg9: memref<8x1xf32, #tpu.memory_space<vmem>>, %arg10: memref<8x128xf32, #tpu.memory_space<vmem>>) attributes {dimension_semantics = [#tpu.dimension_semantics<parallel>, #tpu.dimension_semantics<parallel>, #tpu.dimension_semantics<arbitrary>], iteration_bounds = array<i64: 2, 1, 1>, scalar_prefetch = 0 : i64, scratch_operands = 4 : i64, tpu.core_type = #tpu.core_type<tc>, window_params = [{transform_indices = @transform_0, window_bounds = array<i64: 1, 8, 128>}, {transform_indices = @transform_1, window_bounds = array<i64: 1, 8, 128>}, {transform_indices = @transform_2, window_bounds = array<i64: 1, 8, 128>}, {transform_indices = @transform_3, window_bounds = array<i64: 1, 8, 128>}]} {
    %c0_i32 = arith.constant 0 : i32
    %0 = arith.cmpi eq, %arg2, %c0_i32 : i32
    %1 = arith.extui %0 : i1 to i32
    %c0_i32_0 = arith.constant 0 : i32
    %2 = arith.cmpi ne, %1, %c0_i32_0 : i32
    scf.if %2 {
      %c0_25 = arith.constant 0 : index
      %c0_26 = arith.constant 0 : index
      %c0_27 = arith.constant 0 : index
      %34 = vector.load %arg3[%c0_25, %c0_26, %c0_27] : memref<1x8x128xf32, #tpu.memory_space<vmem>>, vector<1x8x128xf32>
      %35 = vector.shape_cast %34 : vector<1x8x128xf32> to vector<8x128xf32>
      %cst_28 = arith.constant 0.176776692 : f32
      %36 = vector.broadcast %cst_28 : f32 to vector<8x128xf32>
      %37 = arith.mulf %35, %36 : vector<8x128xf32>
      %c0_29 = arith.constant 0 : index
      %c0_30 = arith.constant 0 : index
      %38 = vector.load %arg7[%c0_29, %c0_30] : memref<8x128xf32, #tpu.memory_space<vmem>>, vector<8x128xf32>
      tpu.vector_store %arg7[%c0_29, %c0_30], %37 {strides = array<i32>} : memref<8x128xf32, #tpu.memory_space<vmem>>, vector<8x128xf32>,
      %cst_31 = arith.constant 0xFF800000 : f32
      %39 = vector.broadcast %cst_31 : f32 to vector<8x1xf32>
      %c0_32 = arith.constant 0 : index
      %c0_33 = arith.constant 0 : index
      %40 = vector.load %arg8[%c0_32, %c0_33] : memref<8x1xf32, #tpu.memory_space<vmem>>, vector<8x1xf32>
      tpu.vector_store %arg8[%c0_32, %c0_33], %39 {strides = array<i32>} : memref<8x1xf32, #tpu.memory_space<vmem>>, vector<8x1xf32>,
      %cst_34 = arith.constant 0.000000e+00 : f32
      %41 = vector.broadcast %cst_34 : f32 to vector<8x1xf32>
      %c0_35 = arith.constant 0 : index
      %c0_36 = arith.constant 0 : index
      %42 = vector.load %arg9[%c0_35, %c0_36] : memref<8x1xf32, #tpu.memory_space<vmem>>, vector<8x1xf32>
      tpu.vector_store %arg9[%c0_35, %c0_36], %41 {strides = array<i32>} : memref<8x1xf32, #tpu.memory_space<vmem>>, vector<8x1xf32>,
      %cst_37 = arith.constant 0.000000e+00 : f32
      %43 = vector.broadcast %cst_37 : f32 to vector<8x128xf32>
      %c0_38 = arith.constant 0 : index
      %c0_39 = arith.constant 0 : index
      %44 = vector.load %arg10[%c0_38, %c0_39] : memref<8x128xf32, #tpu.memory_space<vmem>>, vector<8x128xf32>
      tpu.vector_store %arg10[%c0_38, %c0_39], %43 {strides = array<i32>} : memref<8x128xf32, #tpu.memory_space<vmem>>, vector<8x128xf32>,
    } else {
    }
    %c0 = arith.constant 0 : index
    %c0_1 = arith.constant 0 : index
    %3 = vector.load %arg7[%c0, %c0_1] : memref<8x128xf32, #tpu.memory_space<vmem>>, vector<8x128xf32>
    %c0_2 = arith.constant 0 : index
    %c0_3 = arith.constant 0 : index
    %c0_4 = arith.constant 0 : index
    %4 = vector.load %arg4[%c0_2, %c0_3, %c0_4] : memref<1x8x128xf32, #tpu.memory_space<vmem>>, vector<1x8x128xf32>
    %5 = vector.shape_cast %4 : vector<1x8x128xf32> to vector<8x128xf32>
    %c0_5 = arith.constant 0 : index
    %c0_6 = arith.constant 0 : index
    %c0_7 = arith.constant 0 : index
    %6 = vector.load %arg5[%c0_5, %c0_6, %c0_7] : memref<1x8x128xf32, #tpu.memory_space<vmem>>, vector<1x8x128xf32>
    %7 = vector.shape_cast %6 : vector<1x8x128xf32> to vector<8x128xf32>
    %cst = arith.constant dense<0.000000e+00> : vector<8x8xf32>
    %8 = tpu.matmul %3, %5, %cst {dimension_numbers = #tpu.dot_dimension_numbers<[1], [1], [0], [0], [0, 0, 1, 0], [], []>} : vector<8x128xf32>, vector<8x128xf32>, vector<8x8xf32> -> vector<8x8xf32>
    %c0_8 = arith.constant 0 : index
    %c0_9 = arith.constant 0 : index
    %9 = vector.load %arg8[%c0_8, %c0_9] : memref<8x1xf32, #tpu.memory_space<vmem>>, vector<8x1xf32>
    %cst_10 = arith.constant dense<0xFF800000> : vector<8xf32>
    %10 = vector.multi_reduction <maximumf>, %8, %cst_10 [1] : vector<8x8xf32> to vector<8xf32>
    %11 = vector.shape_cast %10 : vector<8xf32> to vector<8x1xf32>
    %12 = arith.maximumf %9, %11 : vector<8x1xf32>
    %13 = arith.subf %9, %12 : vector<8x1xf32>
    %14 = math.exp %13 : vector<8x1xf32>
    %15 = vector.broadcast %12 : vector<8x1xf32> to vector<8x8xf32>
    %16 = arith.subf %8, %15 : vector<8x8xf32>
    %17 = math.exp %16 : vector<8x8xf32>
    %c0_11 = arith.constant 0 : index
    %c0_12 = arith.constant 0 : index
    %18 = vector.load %arg9[%c0_11, %c0_12] : memref<8x1xf32, #tpu.memory_space<vmem>>, vector<8x1xf32>
    %19 = arith.mulf %14, %18 : vector<8x1xf32>
    %cst_13 = arith.constant dense<0.000000e+00> : vector<8xf32>
    %20 = vector.multi_reduction <add>, %17, %cst_13 [1] : vector<8x8xf32> to vector<8xf32>
    %21 = vector.shape_cast %20 : vector<8xf32> to vector<8x1xf32>
    %22 = arith.addf %19, %21 : vector<8x1xf32>
    %c0_14 = arith.constant 0 : index
    %c0_15 = arith.constant 0 : index
    %23 = vector.load %arg9[%c0_14, %c0_15] : memref<8x1xf32, #tpu.memory_space<vmem>>, vector<8x1xf32>
    tpu.vector_store %arg9[%c0_14, %c0_15], %22 {strides = array<i32>} : memref<8x1xf32, #tpu.memory_space<vmem>>, vector<8x1xf32>,
    %c0_16 = arith.constant 0 : index
    %c0_17 = arith.constant 0 : index
    %24 = vector.load %arg10[%c0_16, %c0_17] : memref<8x128xf32, #tpu.memory_space<vmem>>, vector<8x128xf32>
    %25 = vector.broadcast %14 : vector<8x1xf32> to vector<8x128xf32>
    %26 = arith.mulf %25, %24 : vector<8x128xf32>
    %cst_18 = arith.constant dense<0.000000e+00> : vector<8x128xf32>
    %27 = tpu.matmul %17, %7, %cst_18 {dimension_numbers = #tpu.dot_dimension_numbers<[1], [0], [0], [1], [0, 0, 1, 1], [], []>} : vector<8x8xf32>, vector<8x128xf32>, vector<8x128xf32> -> vector<8x128xf32>
    %28 = arith.addf %26, %27 : vector<8x128xf32>
    %c0_19 = arith.constant 0 : index
    %c0_20 = arith.constant 0 : index
    %29 = vector.load %arg10[%c0_19, %c0_20] : memref<8x128xf32, #tpu.memory_space<vmem>>, vector<8x128xf32>
    tpu.vector_store %arg10[%c0_19, %c0_20], %28 {strides = array<i32>} : memref<8x128xf32, #tpu.memory_space<vmem>>, vector<8x128xf32>,
    %c0_21 = arith.constant 0 : index
    %c0_22 = arith.constant 0 : index
    %30 = vector.load %arg8[%c0_21, %c0_22] : memref<8x1xf32, #tpu.memory_space<vmem>>, vector<8x1xf32>
    tpu.vector_store %arg8[%c0_21, %c0_22], %12 {strides = array<i32>} : memref<8x1xf32, #tpu.memory_space<vmem>>, vector<8x1xf32>,
    %c0_i32_23 = arith.constant 0 : i32
    %31 = arith.cmpi eq, %arg2, %c0_i32_23 : i32
    %32 = arith.extui %31 : i1 to i32
    %c0_i32_24 = arith.constant 0 : i32
    %33 = arith.cmpi ne, %32, %c0_i32_24 : i32
    scf.if %33 {
      %c0_25 = arith.constant 0 : index
      %c0_26 = arith.constant 0 : index
      %34 = vector.load %arg9[%c0_25, %c0_26] : memref<8x1xf32, #tpu.memory_space<vmem>>, vector<8x1xf32>
      %35 = tpu.reciprocal %34 : vector<8x1xf32> -> vector<8x1xf32>
      %c0_27 = arith.constant 0 : index
      %c0_28 = arith.constant 0 : index
      %36 = vector.load %arg10[%c0_27, %c0_28] : memref<8x128xf32, #tpu.memory_space<vmem>>, vector<8x128xf32>
      %37 = vector.broadcast %35 : vector<8x1xf32> to vector<8x128xf32>
      %38 = arith.mulf %36, %37 : vector<8x128xf32>
      %c0_29 = arith.constant 0 : index
      %c0_30 = arith.constant 0 : index
      %c0_31 = arith.constant 0 : index
      %39 = vector.load %arg6[%c0_29, %c0_30, %c0_31] : memref<1x8x128xf32, #tpu.memory_space<vmem>>, vector<1x8x128xf32>
      %40 = vector.shape_cast %39 : vector<1x8x128xf32> to vector<8x128xf32>
      %41 = vector.shape_cast %38 : vector<8x128xf32> to vector<1x8x128xf32>
      tpu.vector_store %arg6[%c0_29, %c0_30, %c0_31], %41 {strides = array<i32>} : memref<1x8x128xf32, #tpu.memory_space<vmem>>, vector<1x8x128xf32>,
    } else {
    }
    return
  }
  func.func @transform_0(%arg0: i32, %arg1: i32, %arg2: i32) -> (i32, i32, i32) {
    %c0_i32 = arith.constant 0 : i32
    %c0_i32_0 = arith.constant 0 : i32
    return %arg0, %arg1, %c0_i32 : i32, i32, i32
  }
  func.func @transform_1(%arg0: i32, %arg1: i32, %arg2: i32) -> (i32, i32, i32) {
    %c0_i32 = arith.constant 0 : i32
    %c0_i32_0 = arith.constant 0 : i32
    return %arg0, %arg2, %c0_i32 : i32, i32, i32
  }
  func.func @transform_2(%arg0: i32, %arg1: i32, %arg2: i32) -> (i32, i32, i32) {
    %c0_i32 = arith.constant 0 : i32
    %c0_i32_0 = arith.constant 0 : i32
    return %arg0, %arg2, %c0_i32 : i32, i32, i32
  }
  func.func @transform_3(%arg0: i32, %arg1: i32, %arg2: i32) -> (i32, i32, i32) {
    %c0_i32 = arith.constant 0 : i32
    %c0_i32_0 = arith.constant 0 : i32
    return %arg0, %arg1, %c0_i32 : i32, i32, i32
  }
}

</mosaic_0001>

<bundles_post_ra>
// kernel: tpu_custom_call.1
= control target key start
LH: loop header
LB: loop body
LE: loop exit
PB: predicated region body
PF: predicated region fallthrough
CT: control target
= control target key end

     0   :  { %s1026_s0 = inlined_call_operand.hbm [shape: f32[2,8,128], index: 0, kind: input, shape index: {}]   ;;  %s1027_s1 = inlined_call_operand.hbm [shape: f32[2,8,128], index: 1, kind: input, shape index: {}]   ;;  %s1028_s2 = inlined_call_operand.hbm [shape: f32[2,8,128], index: 2, kind: input, shape index: {}]   ;;  %s1029_s3 = inlined_call_operand.hbm [shape: f32[2,8,128], index: 3, kind: output, shape index: {}]  }
   0x1   :  { %1032 = sst [smem:[#allocation19_spill]] %s1027_s1 }
   0x2   :  { %8 = vsyncpa [#allocation7], 0 }
   0x3   :  { %10 = vsyncpa [#allocation7 + $0x1], 0 }
   0x4   :  { %11 = vsyncpa [#allocation10], 0 }
   0x5   :  { %13 = vsyncpa [#allocation10 + $0x1], 0 }
   0x6   :  { %14 = vsyncpa [#allocation8], 0 }
   0x7   :  { %16 = vsyncpa [#allocation8 + $0x1], 0  ;;  %s861_s12 = smov 0   ;;  %s863_s13 = smov 0  }
   0x8   :  { %s865_s14 = smov 0   ;;  %s867_s15 = smov 0  }
   0x9   :  { %s869_s16 = smov 0   ;;  %s871_s17 = smov 0  }
   0xa LB: > { %1033 = sst [smem:[#allocation16_spill]] %s832_s16  ;;  %s892_s18 = sadd.s32 4294967295, %s836_s17   ;;  %s836_s17 = sphi %s871_s17, %s22_s17   ;;  %s832_s16 = sphi %s869_s16, %s1045_s16   ;;  %s828_s15 = sphi %s867_s15, %s1044_s15   ;;  %s824_s14 = sphi %s865_s14, %s1048_s14   ;;  %s820_s13 = sphi %s863_s13, %s1047_s13   ;;  %s816_s12 = sphi %s861_s12, %s1046_s12  }
   0xb   : > { %s557_s19 = sadd.s32 4294967294, %s836_s17   ;;  %s41_s20 = sadd.s32 1, %s832_s16 }
   0xc   : > { %s50_s21 = sadd.s32 1, %s824_s14  ;;  %p43_p0 = scmp.ge.s32.totalorder %s41_s20, 2 }
   0xd   : > { %p57_p1 = scmp.ne.s32.totalorder %s824_s14, %s820_s13  ;;  %p58_p2 = scmp.eq.s32.totalorder %s836_s17, 0 }
   0xe   : > { %p63_p3 = scmp.ne.s32.totalorder %s820_s13, %s816_s12  ;;  %s1050_s20 = smov (%p43_p0, %s41_s20), 0 }
   0xf   : > { %1034 = sst [smem:[#allocation17_spill]] %s1050_s20  ;;  %p904_p4 = por %p58_p2, %p57_p1 }
  0x10   : > { %p64_p5 = scmp.eq.s32.totalorder %s892_s18, 0  ;;  %s45_s23 = ssub.s32 %s832_s16, %s1050_s20 }
  0x11   : > { %p145_p6 = scmp.eq.s32.totalorder %s892_s18, 1  ;;  %p48_p7 = scmp.eq.s32.totalorder %s45_s23, 0 }
  0x12   : > { %p912_p8 = por %p64_p5, %p63_p3  ;;  %p151_p10 = scmp.eq.s32.totalorder %s557_s19, 1 }
  0x13   : > { %p916_p9 = por %p145_p6, %p57_p1  ;;  %p559_p12 = scmp.ge.s32.totalorder %s836_s17, 2 }
  0x14   : > { %s921_s26 = scalar_select %p48_p7, %s824_s14, %s50_s21  }
  0x15   : > { %p923_p11 = por %p151_p10, %p63_p3  ;;  %p598_p13 = scmp.lt.s32.totalorder %s836_s17, 2 }
  0x16   : > { %1038 = sst [smem:[#allocation18_spill]] %s921_s26  ;;  %s171_s28 = sand.u32 1, %s824_s14  }
  0x17   : > { %s560_s29 = sshll.u32 %s171_s28, 3  ;;  %s561_s30 = sshll.u32 %s832_s16, 3 }
  0x18   : > { %p933_p0 = pnand %p598_p13, %p904_p4  ;;  %s191_s5 = sand.u32 1, %s836_s17  }
  0x19   : > { %s1041_s1 = sld [smem:[#allocation19_spill]]  ;;  %s195_s10 = scalar_lea.vmem [#allocation9], %s560_s29 }
  0x1a   : > { %s204_s11 = sshll.u32 %s195_s10, 4  ;;  %s192_s19 = scalar_lea.sflag [#allocation10], %s191_s5  ;;  %s205_s11 = int_to_ptr.vmem [resolvable:$true] %s204_s11 }
  0x1b   : > { %p566_p1 = scmp.ge.s32.totalorder %s836_s17, 1  ;;  %p229_p2 = scmp.lt.s32.totalorder %s836_s17, 3 }
  0x1c   : > { %s180_s6 = scalar_lea.hbm %s1026_s0, %s561_s30  ;;  %s172_s10 = scalar_lea.sflag [#allocation7], %s171_s28 }
  0x1d   : > { %p945_p3 = pnand %p566_p1, %p229_p2  ;;  %s182_s7 = sshll.u32 %s180_s6, 4  ;;  %s183_s7 = int_to_ptr.hbm [resolvable:$true] %s182_s7 }
  0x1e   : > { %s215_s16 = scalar_lea.vmem [#allocation11], %s560_s29  ;;  %s962_s22 = sand.u32 (!%p945_p3), 1, %s820_s13  }
  0x1f   : > { %s200_s8 = scalar_lea.hbm %s1041_s1, %s561_s30  ;;  %s224_s26 = sshll.u32 %s215_s16, 4  ;;  %s225_s26 = int_to_ptr.vmem [resolvable:$true] %s224_s26 }
  0x20   : > { %s202_s9 = sshll.u32 %s200_s8, 4  ;;  %s175_s8 = scalar_lea.vmem [#allocation6], %s560_s29  ;;  %s203_s9 = int_to_ptr.hbm [resolvable:$true] %s202_s9 }
  0x21   : > { %590 = dma.hbm_to_vmem [thread:$0]  (!%p933_p0), %s203_s9, 128, %s205_s11, %s192_s19  }
  0x22   : > { %s184_s1 = sshll.u32 %s175_s8, 4  ;;  %s220_s11 = scalar_lea.hbm %s1028_s2, %s561_s30  ;;  %s185_s1 = int_to_ptr.vmem [resolvable:$true] %s184_s1 }
  0x23   : > { %587 = dma.hbm_to_vmem [thread:$0]  (!%p933_p0), %s183_s7, 128, %s185_s1, %s172_s10  }
  0x24   : > { %s222_s20 = sshll.u32 %s220_s11, 4  ;;  %233 = sbr.rel (%p945_p3) target bundleno = 660 (0x294), region = 32  ;;  %s223_s20 = int_to_ptr.hbm [resolvable:$true] %s222_s20 }
  0x25   : > { %593 = dma.hbm_to_vmem [thread:$0]  (!%p933_p0), %s223_s20, 128, %s225_s26, %s192_s19  }
  0x26   : > { %s965_s1 = sshll.u32 (!%p945_p3), %s962_s22, 3  ;;  %s236_s28 = scalar_lea.sflag (!%p945_p3), [#allocation7], %s962_s22 }
  0x27   : > { %s239_s30 = scalar_lea.vmem (!%p945_p3), [#allocation6], %s965_s1 }
  0x29   : > { %803 = dma.done.wait (%p912_p8), %s236_s28, 128  }
  0x2a   : > { %805 = vsyncadd (%p912_p8), %s236_s28, 4294967168  ;;  %s245_s16 = sand.u32 1, %s892_s18   ;;  %s249_s26 = scalar_lea.vmem [#allocation9], %s965_s1 }
  0x2b   : > { %s246_s20 = scalar_lea.sflag [#allocation10], %s245_s16 }
  0x2c   : > { %807 = dma.done.wait (%p912_p8), %s246_s20, 256  }
  0x2d   : > { %809 = vsyncadd (%p912_p8), %s246_s20, 4294967040  ;;  %v305_v0 = vld [vmem:[%s249_s26] sm:$0xff]  ;;  %v297_v1 = vld [vmem:[%s239_s30] sm:$0xff]  ;;  %vm300_vm0 = vcmask 7168   ;;  %v838_v3 = vmov -inf   ;;  %vm328_vm1 = vcmask 64512  }
  0x2e   : > { %322 = vmatpush.xpose.msra.mxu0 %v305_v0  ;;  %v298_v2 = vmul.f32 0.17677669, %v297_v1  ;;  %301 = vst.msk [vmem:[#allocation3] sm:$0xff] %vm300_vm0, %v838_v3  ;;  %v839_v6 = vmov 0   ;;  %v840_v7 = vmov 0.0   ;;  %s259_s18 = scalar_lea.vmem [#allocation11], %s965_s1 }
  0x2f   : > { %651 = vset.pattern.permute.xlu0 %v839_v6  ;;  %652 = vset.pattern.permute.xlu1 %v839_v6  ;;  %302 = vst.msk [vmem:[#allocation4] sm:$0xff] %vm300_vm0, %v840_v7  ;;  %v306_v12 = vld [vmem:[%s259_s18] sm:$0xff]  ;;  %s573_s24 = sshll.u32 %s828_s15, 3  ;;  %s292_s21 = scalar_lea.vmem [#allocation12], %s965_s1 }
  0x30   : > { %653 = vset.pattern.permute.xlu2 %v839_v6  ;;  %377 = vmatpush.msra.mxu1 %v306_v12  ;;  %s423_s19 = scalar_lea.hbm %s1029_s3, %s573_s24  ;;  %s425_s23 = sshll.u32 %s292_s21, 4  ;;  %s426_s23 = int_to_ptr.vmem [resolvable:$true] %s425_s23 }
  0x31   : > { %323 = vmatmul.f32.vlgmr.msra.gmra.mxu0 %v298_v2  ;;  %s427_s6 = sshll.u32 %s423_s19, 4  ;;  %s412_s7 = scalar_lea.sflag [#allocation8], %s962_s22  ;;  %s428_s6 = int_to_ptr.hbm [resolvable:$true] %s427_s6 }
  0x32   : > { %s764_s8 = sshra.s32 %s428_s6, 4  ;;  %s770_s9 = scalar_lea.hbm %s1029_s3, 16  ;;  %s765_s8 = int_to_ptr.hbm [resolvable:$true] %s764_s8 }
  0x33   : > { %s766_s15 = scalar_lea.hbm %s765_s8, 8  ;;  %p771_p7 = scmp.lt.s32.totalorder %s765_s8, %s1029_s3 }
  0x34   : > { %p767_p4 = scmp.ne.s32.totalorder %s765_s8, %s766_s15  ;;  %p772_p8 = scmp.lt.s32.totalorder %s770_s9, %s766_s15 }
  0x35   : > { %v327_v8 = vld [vmem:[#allocation3] sm:$0xff] }
  0x36   : > { %v344_v20 = vld [vmem:[#allocation4] sm:$0xff]  ;;  %p768_p5 = pnand %p767_p4, %p916_p9  ;;  %p773_p10 = por %p772_p8, %p771_p7 }
  0x38   : > { %p769_p6 = pneg %p768_p5 }
  0x3a   : > { %p774_p13 = pnand %p773_p10, %p769_p6 }
  0xae   : > { %v324_v4 = vpop.f32.mrf.mxu0 }
  0xaf   : > { %v329_v5 = vsel %vm328_vm1, %v324_v4, -inf }
  0xb0   : > { %330 = vmax.xlane.f32.xlu0 %v329_v5 }
 0x123   : > { %v331_v9 = vpop.xlane.xlu0 %330 }
 0x124   : > { %v332_v10 = vmax.f32 %v327_v8, %v331_v9 }
 0x126   : > { %v333_v11 = vsub.f32 %v327_v8, %v332_v10  ;;  %384 = vst.msk [vmem:[#allocation3] sm:$0xff] %vm300_vm0, %v332_v10  ;;  %338 = vperm.xlu0 %651, %v332_v10  }
 0x128   : > { %v334_v18 = vmul.f32 1.442695, %v333_v11 }
 0x198   : > { %v339_v13 = vpop.permute.xlu0 %338 }
 0x199   : > { %v341_v14 = vsub.f32 %v324_v4, %v339_v13 }
 0x19b   : > { %v342_v15 = vmul.f32 1.442695, %v341_v14 }
 0x19d   : > { %654 = vpow2.f32 %v342_v15 }
 0x19e   : > { %656 = vpow2.f32 %v334_v18 }
 0x1a3   : > { %v655_v16 = vpop.eup %654 }
 0x1a4   : > { %571 = vmatmul.msk.f32.vlgmr.msra.gmra.mxu1 %vm328_vm1, %v655_v16  ;;  %v346_v17 = vsel %vm328_vm1, %v655_v16, 0.0  ;;  %v657_v19 = vpop.eup %656 }
 0x1a5   : > { %347 = vadd.xlane.f32.xlu1 %v346_v17  ;;  %v345_v21 = vmul.f32 %v657_v19, %v344_v20 }
 0x1be   : > { %355 = vperm.xlu1 %652, %v657_v19  }
 0x218   : > { %v348_v22 = vpop.xlane.xlu1 %347 }
 0x219   : > { %v349_v23 = vadd.f32 %v348_v22, %v345_v21 }
 0x21b   : > { %351 = vst.msk [vmem:[#allocation4] sm:$0xff] %vm300_vm0, %v349_v23 }
 0x221   : > { %v379_v37 = vpop.f32.mrf.mxu1 }
 0x222   : > { %v388_v24 = vld [vmem:[#allocation4] sm:$0xff] }
 0x223   : > { %658 = vrcp.f32 %v388_v24  ;;  %v400_v28 = vand.u32 2147483648, %v388_v24  ;;  %v398_v30 = vand.u32 2147483647, %v388_v24  ;;  %vm394_vm3 = vweird.f32 %v388_v24 }
 0x225   : > { %v401_v32 = vor.u32 1.1754944e-38, %v400_v28  ;;  %vm399_vm5 = vcmp.eq.f32.partialorder %v398_v30, 8.507059e+37 }
 0x229   : > { %v659_v25 = vpop.eup %658 }
 0x22a   : > { %v390_v26 = vmul.f32 %v659_v25, %v388_v24  ;;  %vm395_vm2 = vweird.f32 %v659_v25 }
 0x22b   : > { %vm396_vm4 = vmor %vm394_vm3, %vm395_vm2 }
 0x22c   : > { %v391_v27 = vsub.f32 1.0, %v390_v26 }
 0x22e   : > { %v392_v29 = vmul.f32 %v659_v25, %v391_v27 }
 0x230   : > { %v393_v31 = vadd.f32 %v659_v25, %v392_v29  ;;  %v356_v35 = vpop.permute.xlu1 %355 }
 0x231   : > { %v358_v36 = vmul.f32 0.0, %v356_v35 }
 0x232   : > { %v397_v33 = vsel %vm396_vm4, %v659_v25, %v393_v31 }
 0x233   : > { %v402_v34 = vsel %vm399_vm5, %v401_v32, %v397_v33  ;;  %v382_v38 = vadd.f32 %v379_v37, %v358_v36 }
 0x234   : > { %406 = vperm.xlu2 %653, %v402_v34  }
 0x28e   : > { %v407_v39 = vpop.permute.xlu2 %406 }
 0x28f   : > { %v409_v40 = vmul.f32 %v407_v39, %v382_v38 }
 0x291   : > { %410 = vst [vmem:[%s292_s21] sm:$0xff] %v409_v40 }
 0x292   : > { %777 = shalt.err (!%p774_p13)
}
 0x293   : > { %582 = dma.vmem_to_hbm [thread:$0]  (%p916_p9), %s426_s23, 128, %s428_s6, %s412_s7  }
 0x294 PF: > { %s439_s22 = sand.u32 1, %s816_s12   ;;  %p595_p0 = pnand %p559_p12, %p923_p11 }
 0x295   : > { %s440_s28 = scalar_lea.sflag [#allocation8], %s439_s22 }
 0x296   : > { %p596_p1 = pneg %p595_p0 }
 0x298   : > { %811 = dma.done.wait (%p596_p1), %s440_s28, 128  }
 0x299   : > { %813 = vsyncadd (%p596_p1), %s440_s28, 4294967168  ;;  %s22_s17 = sadd.s32 1, %s836_s17   ;;  %s1043_s30 = sld [smem:[#allocation18_spill]] }
 0x29a   : > { %p19_p2 = scmp.ge.s32.totalorder %s22_s17, 4   ;;  %s1044_s15 = sld [smem:[#allocation16_spill]] }
 0x29b   : > { %s1045_s16 = sld [smem:[#allocation17_spill]]  ;;  %s1046_s12 = smov %s820_s13 }
 0x29c   : > { %s1047_s13 = smov %s824_s14  ;;  %21 = sbr.rel (!%p19_p2) target bundleno = 10 (0xa), region = 109 }
 0x29f   : > { %s1048_s14 = smov %s1043_s30 }
 0x2a1   :  { %446 = vsyncpa [#allocation7], 1 }
 0x2a2   :  { %448 = vsyncpa [#allocation7 + $0x1], 1 }
 0x2a3   :  { %449 = vsyncpa [#allocation10], 1 }
 0x2a4   :  { %451 = vsyncpa [#allocation10 + $0x1], 1 }
 0x2a5   :  { %452 = vsyncpa [#allocation8], 1 }
 0x2a6   :  { %454 = vsyncpa [#allocation8 + $0x1], 1 }

</bundles_post_ra>
